<compile_context>
chip_gen: v5e
topology: v5e:2x2
jax: 0.10.0
libtpu: 0.0.40
codegen_flags: <defaults>
</compile_context>

<pallas_src>
import jax
import jax.numpy as jnp
from jax.experimental import pallas as pl
from jax.experimental.pallas import tpu as pltpu

_EPS = 1e-8  # Python literal -> compile-time constant inside the kernel.


def _pixelnorm_kernel(x_ref, o_ref):
    # x_ref / o_ref: (Nb, C, TILE); lanes = flattened spatial, sublanes = channels.
    x = x_ref[...]
    xf = x.astype(jnp.float32)
    m = jnp.mean(xf * xf, axis=1, keepdims=True)            # channel reduce (XLU)
    scale = jax.lax.rsqrt(m + jnp.float32(_EPS))            # EUP
    # Final multiply in the input dtype (f32 path unchanged; bf16 path avoids
    # upcasting the whole tile on the store path).
    o_ref[...] = (x * scale.astype(x.dtype)).astype(o_ref.dtype)


def _vmem_capacity_bytes():
    """Physical VMEM per TensorCore; conservative fallback if query unavailable."""
    try:
        return int(pltpu.get_tpu_info().vmem_capacity_bytes)
    except Exception:
        return 64 << 20  # v7x per-core VMEM (smallest current generation)


def _pick_blocks(n, c, hw_pad, itemsize, budget_bytes):
    """Choose (tile, nb): lane-aligned spatial tile and #batch rows per block.

    Budget accounts for double-buffered in+out blocks at the input dtype plus
    ~2 f32-sized in-kernel temporaries per element.
    """
    per_col = c * (4 * itemsize + 8)          # bytes per spatial column of the block
    max_cols = max(1, budget_bytes // per_col)

    # Largest multiple of 128 that divides hw_pad and fits the budget.
    max_tile = max(128, (min(hw_pad, max_cols) // 128) * 128)
    tile = min(hw_pad, max_tile)
    while hw_pad % tile:
        tile -= 128                           # terminates: hw_pad % 128 == 0

    # If the whole spatial extent fits in one tile, pack batch rows per block.
    nb = 1
    if tile == hw_pad and n > 1:
        limit = max(1, max_cols // tile)
        for cand in range(min(n, limit), 0, -1):
            if n % cand == 0:
                nb = cand
                break
    return tile, nb


def pixel_norm(x):
    """PixelNorm.forward for NCHW input, any float dtype (mean in f32)."""
    n, c, h, w = x.shape
    hw = h * w
    x_flat = x.reshape(n, c, hw)

    # Pad HW to a multiple of 128 -> lane-dense (unmasked) stores, bounded VMEM.
    hw_pad = ((hw + 127) // 128) * 128
    if hw_pad != hw:
        x_flat = jnp.pad(x_flat, ((0, 0), (0, 0), (0, hw_pad - hw)))

    itemsize = x.dtype.itemsize
    vmem_cap = _vmem_capacity_bytes()
    budget = vmem_cap // 4                    # per-generation tile budget
    tile, nb = _pick_blocks(n, c, hw_pad, itemsize, budget)

    # VMEM limit: actual pipelined footprint + headroom, capped at 3/4 physical.
    footprint = nb * tile * c * (4 * itemsize + 8)
    vmem_limit = int(min(footprint + (16 << 20), vmem_cap * 3 // 4))

    n_blk_spatial = hw_pad // tile
    n_blk_batch = n // nb

    # Put the larger parallel axis first so v7x's 2 TensorCores split evenly.
    if n_blk_spatial >= n_blk_batch:
        grid = (n_blk_spatial, n_blk_batch)
        index_map = lambda j, i: (i, 0, j)
    else:
        grid = (n_blk_batch, n_blk_spatial)
        index_map = lambda i, j: (i, 0, j)

    out = pl.pallas_call(
        _pixelnorm_kernel,
        out_shape=jax.ShapeDtypeStruct((n, c, hw_pad), x.dtype),
        grid=grid,
        in_specs=[pl.BlockSpec((nb, c, tile), index_map)],
        out_specs=pl.BlockSpec((nb, c, tile), index_map),
        compiler_params=pltpu.CompilerParams(
            dimension_semantics=("parallel", "parallel"),
            vmem_limit_bytes=vmem_limit,
        ),
        cost_estimate=pl.CostEstimate(
            flops=int(3 * n * c * hw),
            transcendentals=int(n * hw),
            bytes_accessed=int(2 * n * c * hw * itemsize),
        ),
    )(x_flat)

    if hw_pad != hw:
        out = out[:, :, :hw]
    return out.reshape(n, c, h, w)


@jax.jit
def run(x):
    return pixel_norm(x)


if __name__ == "__main__":
    key = jax.random.PRNGKey(0)
    x = jax.random.normal(key, (2, 4, 16, 16), jnp.float32)   # NCHW

    out = jax.block_until_ready(run(x))

    # Reference check against the PyTorch semantics.
    ref = x / jnp.sqrt(jnp.mean(x * x, axis=1, keepdims=True) + _EPS)
    assert out.shape == x.shape, out.shape
    assert bool(jnp.all(jnp.isfinite(out)))
    assert bool(jnp.allclose(out, ref, atol=1e-5, rtol=1e-5))

    # Extra check: unaligned spatial size exercises the pad/slice path.
    x2 = jax.random.normal(jax.random.PRNGKey(1), (2, 8, 5, 7), jnp.float32)
    out2 = jax.block_until_ready(jax.jit(pixel_norm)(x2))
    ref2 = x2 / jnp.sqrt(jnp.mean(x2 * x2, axis=1, keepdims=True) + _EPS)
    assert bool(jnp.allclose(out2, ref2, atol=1e-5, rtol=1e-5))

    print("KERNEL_OK")
</pallas_src>

<mosaic_0001>
module attributes {stable_mosaic.version = 11 : i64} {
  func.func @_pixelnorm_kernel(%arg0: i32, %arg1: i32, %arg2: memref<2x4x256xf32, #tpu.memory_space<vmem>>, %arg3: memref<2x4x256xf32, #tpu.memory_space<vmem>>) attributes {dimension_semantics = [#tpu.dimension_semantics<parallel>, #tpu.dimension_semantics<parallel>], iteration_bounds = array<i64: 1, 1>, scalar_prefetch = 0 : i64, scratch_operands = 0 : i64, tpu.core_type = #tpu.core_type<tc>, window_params = [{transform_indices = @transform_0, window_bounds = array<i64: 2, 4, 256>}, {transform_indices = @transform_1, window_bounds = array<i64: 2, 4, 256>}]} {
    %c0 = arith.constant 0 : index
    %c0_0 = arith.constant 0 : index
    %c0_1 = arith.constant 0 : index
    %0 = vector.load %arg2[%c0, %c0_0, %c0_1] : memref<2x4x256xf32, #tpu.memory_space<vmem>>, vector<2x4x256xf32>
    %1 = arith.mulf %0, %0 : vector<2x4x256xf32>
    %cst = arith.constant dense<0.000000e+00> : vector<2x256xf32>
    %2 = vector.multi_reduction <add>, %1, %cst [1] : vector<2x4x256xf32> to vector<2x256xf32>
    %3 = vector.shape_cast %2 : vector<2x256xf32> to vector<2x1x256xf32>
    %cst_2 = arith.constant 4.000000e+00 : f32
    %4 = vector.broadcast %cst_2 : f32 to vector<2x1x256xf32>
    %5 = arith.divf %3, %4 : vector<2x1x256xf32>
    %cst_3 = arith.constant 9.99999993E-9 : f32
    %6 = vector.broadcast %cst_3 : f32 to vector<2x1x256xf32>
    %7 = arith.addf %5, %6 : vector<2x1x256xf32>
    %8 = math.rsqrt %7 : vector<2x1x256xf32>
    %9 = vector.broadcast %8 : vector<2x1x256xf32> to vector<2x4x256xf32>
    %10 = arith.mulf %0, %9 : vector<2x4x256xf32>
    %c0_4 = arith.constant 0 : index
    %c0_5 = arith.constant 0 : index
    %c0_6 = arith.constant 0 : index
    %11 = vector.load %arg3[%c0_4, %c0_5, %c0_6] : memref<2x4x256xf32, #tpu.memory_space<vmem>>, vector<2x4x256xf32>
    tpu.vector_store %arg3[%c0_4, %c0_5, %c0_6], %10 {strides = array<i32>} : memref<2x4x256xf32, #tpu.memory_space<vmem>>, vector<2x4x256xf32>,
    return
  }
  func.func @transform_0(%arg0: i32, %arg1: i32) -> (i32, i32, i32) {
    %c0_i32 = arith.constant 0 : i32
    %c0_i32_0 = arith.constant 0 : i32
    return %arg1, %c0_i32, %arg0 : i32, i32, i32
  }
  func.func @transform_1(%arg0: i32, %arg1: i32) -> (i32, i32, i32) {
    %c0_i32 = arith.constant 0 : i32
    %c0_i32_0 = arith.constant 0 : i32
    return %arg1, %c0_i32, %arg0 : i32, i32, i32
  }
}

</mosaic_0001>

<bundles_post_ra>
// kernel: run.1
= control target key start
LH: loop header
LB: loop body
LE: loop exit
PB: predicated region body
PF: predicated region fallthrough
CT: control target
= control target key end

     0   :  { %v138_v2 = vmov 4.0   ;;  %vm25_vm0 = vcmask 1043456   ;;  %s177_s0 = inlined_call_operand.vmem [shape: f32[2,4,256], index: 0, kind: input, shape index: {}]   ;;  %s178_s1 = inlined_call_operand.vmem [shape: f32[2,4,256], index: 1, kind: output, shape index: {}]  }
   0x1   :  { %v152_v0 = vld [vmem:[%s177_s0] sm:$0xff]  ;;  %v157_v1 = vld [vmem:[%s177_s0 + $0x8] sm:$0xff]  ;;  %128 = vrcp.f32 %v138_v2 }
   0x2   :  { %v10_v3 = vmul.f32 %v152_v0, %v152_v0  ;;  %v11_v4 = vmul.f32 %v157_v1, %v157_v1 }
   0x4   :  { %14 = vst [vmem:[#allocation1] ss:$2 sm:$0xff] %v10_v3 }
   0x5   :  { %18 = vst [vmem:[#allocation1 + $0x10] ss:$2 sm:$0xff] %v11_v4 }
   0x7   :  { %v129_v5 = vpop.eup %128 }
   0x8   :  { %v55_v6 = vmul.f32 4.0, %v129_v5  ;;  %vm59_vm1 = vweird.f32 %v129_v5 }
   0xa   :  { %v56_v7 = vsub.f32 1.0, %v55_v6 }
   0xb   :  { %v15_v8 = vld.sshfl [vmem:[#allocation1] sm:$0xff pattern:$0x75316420]  ;;  %v16_v9 = vld.sshfl [vmem:[#allocation1 + $0x8] sm:$0xff pattern:$0x75316420] }
   0xc   :  { %v20_v10 = vld.sshfl [vmem:[#allocation1 + $0x18] sm:$0xff pattern:$0x75316420]  ;;  %v26_v11 = vsel %vm25_vm0, %v15_v8, 0.0  ;;  %v33_v12 = vsel %vm25_vm0, %v16_v9, 0.0  ;;  %v57_v18 = vmul.f32 %v129_v5, %v56_v7 }
   0xd   :  { %v27_v13 = vrot.slane %v26_v11, 4  ;;  %v34_v14 = vrot.slane %v33_v12, 4  ;;  %v47_v15 = vsel %vm25_vm0, %v20_v10, 0.0  ;;  %v19_v16 = vld.sshfl [vmem:[#allocation1 + $0x10] sm:$0xff pattern:$0x75316420] }
   0xe   :  { %v48_v17 = vrot.slane %v47_v15, 4  ;;  %v40_v19 = vsel %vm25_vm0, %v19_v16, 0.0  ;;  %v58_v27 = vadd.f32 %v129_v5, %v57_v18 }
   0xf   :  { %v28_v20 = vadd.f32 %v27_v13, %v26_v11  ;;  %v35_v21 = vadd.f32 %v34_v14, %v33_v12  ;;  %v41_v22 = vrot.slane %v40_v19, 4 }
  0x10   :  { %v49_v23 = vadd.f32 %v48_v17, %v47_v15  ;;  %v60_v36 = vsel %vm59_vm1, %v129_v5, %v58_v27 }
  0x11   :  { %v29_v24 = vrot.slane %v28_v20, 2  ;;  %v36_v25 = vrot.slane %v35_v21, 2  ;;  %v42_v26 = vadd.f32 %v41_v22, %v40_v19 }
  0x12   :  { %v50_v28 = vrot.slane %v49_v23, 2 }
  0x13   :  { %v30_v29 = vadd.f32 %v29_v24, %v28_v20  ;;  %v37_v30 = vadd.f32 %v36_v25, %v35_v21  ;;  %v43_v31 = vrot.slane %v42_v26, 2 }
  0x14   :  { %v51_v32 = vadd.f32 %v50_v28, %v49_v23 }
  0x15   :  { %v31_v33 = vrot.slane %v30_v29, 1  ;;  %v38_v34 = vrot.slane %v37_v30, 1  ;;  %v44_v35 = vadd.f32 %v43_v31, %v42_v26 }
  0x16   :  { %v52_v37 = vrot.slane %v51_v32, 1 }
  0x17   :  { %v32_v38 = vadd.f32 %v31_v33, %v30_v29  ;;  %v39_v39 = vadd.f32 %v38_v34, %v37_v30  ;;  %v45_v40 = vrot.slane %v44_v35, 1 }
  0x18   :  { %v53_v41 = vadd.f32 %v52_v37, %v51_v32 }
  0x19   :  { %v61_v42 = vmul.f32 %v60_v36, %v32_v38  ;;  %v62_v43 = vmul.f32 %v60_v36, %v39_v39  ;;  %v46_v44 = vadd.f32 %v45_v40, %v44_v35 }
  0x1a   :  { %v64_v45 = vmul.f32 %v60_v36, %v53_v41 }
  0x1b   :  { %v65_v46 = vadd.f32 1e-08, %v61_v42  ;;  %v66_v47 = vadd.f32 1e-08, %v62_v43  ;;  %v63_v48 = vmul.f32 %v60_v36, %v46_v44 }
  0x1c   :  { %v68_v49 = vadd.f32 1e-08, %v64_v45 }
  0x1d   :  { %130 = vrsqrt.f32 %v65_v46  ;;  %v67_v50 = vadd.f32 1e-08, %v63_v48  ;;  %vm85_vm4 = vweird.f32 %v66_v47  ;;  %vm75_vm6 = vweird.f32 %v65_v46 }
  0x1e   :  { %132 = vrsqrt.f32 %v66_v47  ;;  %vm105_vm8 = vweird.f32 %v68_v49 }
  0x1f   :  { %134 = vrsqrt.f32 %v67_v50  ;;  %vm95_vm12 = vweird.f32 %v67_v50 }
  0x20   :  { %136 = vrsqrt.f32 %v68_v49 }
  0x23   :  { %v131_v51 = vpop.eup %130 }
  0x24   :  { %v133_v52 = vpop.eup %132  ;;  %v70_v53 = vmul.f32 %v131_v51, %v65_v46  ;;  %vm76_vm3 = vweird.f32 %v131_v51 }
  0x25   :  { %v135_v54 = vpop.eup %134  ;;  %v80_v55 = vmul.f32 %v133_v52, %v66_v47  ;;  %vm86_vm2 = vweird.f32 %v133_v52  ;;  %vm77_vm9 = vmor %vm75_vm6, %vm76_vm3 }
  0x26   :  { %v137_v56 = vpop.eup %136  ;;  %v71_v57 = vmul.f32 %v131_v51, %v70_v53  ;;  %v90_v58 = vmul.f32 %v135_v54, %v67_v50  ;;  %vm87_vm7 = vmor %vm85_vm4, %vm86_vm2  ;;  %vm96_vm10 = vweird.f32 %v135_v54 }
  0x27   :  { %v81_v59 = vmul.f32 %v133_v52, %v80_v55  ;;  %v100_v60 = vmul.f32 %v137_v56, %v68_v49  ;;  %vm106_vm5 = vweird.f32 %v137_v56  ;;  %vm97_vm13 = vmor %vm95_vm12, %vm96_vm10 }
  0x28   :  { %v72_v61 = vmul.f32 0.5, %v71_v57  ;;  %v91_v62 = vmul.f32 %v135_v54, %v90_v58  ;;  %vm107_vm11 = vmor %vm105_vm8, %vm106_vm5 }
  0x29   :  { %v82_v63 = vmul.f32 0.5, %v81_v59  ;;  %v101_v2 = vmul.f32 %v137_v56, %v100_v60 }
  0x2a   :  { %v73_v3 = vsub.f32 1.5, %v72_v61  ;;  %v92_v4 = vmul.f32 0.5, %v91_v62 }
  0x2b   :  { %v83_v5 = vsub.f32 1.5, %v82_v63  ;;  %v102_v6 = vmul.f32 0.5, %v101_v2 }
  0x2c   :  { %v93_v7 = vsub.f32 1.5, %v92_v4  ;;  %v74_v8 = vmul.f32 %v131_v51, %v73_v3 }
  0x2d   :  { %v84_v9 = vmul.f32 %v133_v52, %v83_v5  ;;  %v103_v10 = vsub.f32 1.5, %v102_v6 }
  0x2e   :  { %v94_v12 = vmul.f32 %v135_v54, %v93_v7  ;;  %v78_v15 = vsel %vm77_vm9, %v131_v51, %v74_v8 }
  0x2f   :  { %v88_v11 = vsel %vm87_vm7, %v133_v52, %v84_v9  ;;  %v104_v13 = vmul.f32 %v137_v56, %v103_v10 }
  0x30   :  { %v113_v14 = vrot.slane %v88_v11, 4  ;;  %v98_v20 = vsel %vm97_vm13, %v135_v54, %v94_v12 }
  0x31   :  { %v108_v16 = vsel %vm107_vm11, %v137_v56, %v104_v13 }
  0x32   :  { %v115_v17 = vsel %vm25_vm0, %v78_v15, %v113_v14  ;;  %v114_v18 = vrot.slane %v108_v16, 4 }
  0x33   :  { %v119_v19 = vmul.f32 %v115_v17, %v152_v0 }
  0x34   :  { %v116_v21 = vsel %vm25_vm0, %v98_v20, %v114_v18 }
  0x35   :  { %121 = vst [vmem:[%s178_s1] sm:$0xff] %v119_v19  ;;  %v120_v22 = vmul.f32 %v116_v21, %v157_v1 }
  0x37   :  { %122 = vst [vmem:[%s178_s1 + $0x8] sm:$0xff] %v120_v22 }

</bundles_post_ra>
